<compile_context>
chip_gen: v5e
topology: v5e:2x2
jax: 0.10.0
libtpu: 0.0.40
codegen_flags: <defaults>
</compile_context>

<pallas_src>
import jax
import jax.numpy as jnp
from jax.experimental import pallas as pl
from jax.experimental.pallas import tpu as pltpu

LN_EPS = 1e-12


# ----------------------------------------------------------------------------
# Kernels
# ----------------------------------------------------------------------------
def _fused_epilogue(y_f32, gamma_ref, beta_ref, o_ref):
    """LayerNorm (biased variance, eps=1e-12) + affine + store.  `y_f32`
    already contains dense-bias + residual in f32.

    Dropout: inference-mode identity.
    TODO(synk): training-mode dropout (pltpu.prng_random_bits mask) not emitted.
    """
    u = jnp.mean(y_f32, axis=-1, keepdims=True)
    d = y_f32 - u
    s = jnp.mean(d * d, axis=-1, keepdims=True)
    norm = d * jax.lax.rsqrt(s + LN_EPS)
    out = (gamma_ref[...].astype(jnp.float32) * norm
           + beta_ref[...].astype(jnp.float32))
    o_ref[...] = out.astype(o_ref.dtype)


def _self_output_fullk_kernel(x_ref, w_ref, b_ref, res_ref, gamma_ref,
                              beta_ref, o_ref):
    # Full-K GEMM for this M tile: (TM, H_in) @ (H_in, H), f32 accumulate on
    # the MXU; result is kept in registers -- no scratch round-trip.
    y = jnp.dot(x_ref[...], w_ref[...], preferred_element_type=jnp.float32)
    y = (y + b_ref[...].astype(jnp.float32)
           + res_ref[...].astype(jnp.float32))
    _fused_epilogue(y, gamma_ref, beta_ref, o_ref)


def _self_output_splitk_kernel(x_ref, w_ref, b_ref, res_ref, gamma_ref,
                               beta_ref, o_ref, acc_ref):
    k = pl.program_id(1)
    nk = pl.num_programs(1)
    part = jnp.dot(x_ref[...], w_ref[...], preferred_element_type=jnp.float32)

    @pl.when(k == 0)
    def _first():
        # Direct write: skips a full (TM, H) f32 zero-init pass.
        acc_ref[...] = part

    @pl.when(jnp.logical_and(k > 0, k < nk - 1))
    def _middle():
        acc_ref[...] += part

    @pl.when(k == nk - 1)
    def _last():
        # Consume the last partial product in registers instead of updating
        # acc_ref and re-reading it (saves one store + load per M tile).
        y = (acc_ref[...] + part
             + b_ref[...].astype(jnp.float32)
             + res_ref[...].astype(jnp.float32))
        _fused_epilogue(y, gamma_ref, beta_ref, o_ref)


# ----------------------------------------------------------------------------
# Tiling / VMEM policy
# ----------------------------------------------------------------------------
def _round_up(x, mult):
    return ((x + mult - 1) // mult) * mult


def _vmem_bytes(tm, tk, h, in_isz, out_isz, use_acc):
    """Per-step VMEM working set, including (8, 128) layout padding and the
    default double-buffering of every BlockSpec operand."""
    tm_p = _round_up(max(tm, 8), 8)
    tk_p = _round_up(tk, 128)
    h_p = _round_up(h, 128)
    streamed = 2 * (tm_p * tk_p * in_isz        # activations tile
                    + tm_p * h_p * in_isz       # residual tile
                    + tm_p * h_p * out_isz)     # output tile
    weight = 2 * tk_p * h_p * in_isz            # weight tile buffers
    small = 3 * 2 * 8 * h_p * in_isz            # bias/gamma/beta ((1,H)->(8,H))
    acc = tm_p * h_p * 4 if use_acc else 0      # f32 accumulator (split-K only)
    return streamed + weight + small + acc


def _vmem_policy():
    """Returns (tile_budget_bytes, scoped_limit_cap_bytes, ensure_two_m_tiles)."""
    try:
        phys = int(pltpu.get_tpu_info().vmem_capacity_bytes)
    except Exception:
        phys = 64 << 20   # unknown hardware -> assume the smallest VMEM (v7x)
    if phys >= (96 << 20):
        # v5e / v6e: 128 MiB physical VMEM, single TensorCore per chip.
        return 96 << 20, 100 << 20, False
    # v7x-class: 64 MiB physical VMEM per TC, 2 TCs per chip.  Leave headroom
    # for Mosaic internal scratch and prefer >= 2 M tiles for megacore sharding.
    return 44 << 20, 54 << 20, True


def _choose_tiles(m, h_in, h, in_isz, out_isz, budget, ensure_two_m_tiles):
    def fits(tm, tk, use_acc):
        return _vmem_bytes(tm, tk, h, in_isz, out_isz, use_acc) <= budget

    if m <= 128:
        m_cands = [m]
        if ensure_two_m_tiles and m >= 16 and m % 16 == 0:
            # Two sublane-aligned M tiles so the "parallel" axis can span both
            # TensorCores on v7x.
            m_cands = [m // 2, m]
    else:
        m_cands = [c for c in (1024, 512, 256, 128) if c <= m]
        if ensure_two_m_tiles:
            two = [c for c in m_cands if pl.cdiv(m, c) >= 2]
            m_cands = two or m_cands

    # 1) Prefer full-K: weight stays VMEM-resident across all M tiles and the
    #    fast-path kernel (no accumulator) is used.
    for tm in m_cands:
        if fits(tm, h_in, use_acc=False):
            return tm, h_in

    # 2) Split K only when full-K genuinely does not fit.  TK must divide H_in
    #    exactly (no garbage-padded K contributions) and be a multiple of 128.
    if h_in % 128 == 0:
        for tm in m_cands:                       # larger TM first: fewer
            for tk in (4096, 2048, 1024, 512, 256, 128):  # weight re-streams
                if tk >= h_in or h_in % tk != 0:
                    continue
                if fits(tm, tk, use_acc=True):
                    return tm, tk

    # 3) Last resort: smallest M tile with full K.
    return m_cands[-1], h_in


# ----------------------------------------------------------------------------
# Wrapper
# ----------------------------------------------------------------------------
def self_output_forward(hidden_states, input_tensor, params):
    """hidden_states: (B, S, H_in) with H_in = hidden_size * num_heads.
       input_tensor:  (B, S, H)    with H    = hidden_size."""
    w, b, gamma, beta = params["w"], params["b"], params["gamma"], params["beta"]
    B, S, H_in = hidden_states.shape
    H = input_tensor.shape[-1]
    M = B * S

    x2d = hidden_states.reshape(M, H_in)
    r2d = input_tensor.reshape(M, H)
    b2d = b.reshape(1, H)
    g2d = gamma.reshape(1, H)
    be2d = beta.reshape(1, H)

    in_isz = jnp.dtype(hidden_states.dtype).itemsize
    out_isz = in_isz

    budget, limit_cap, ensure_two = _vmem_policy()
    TM, TK = _choose_tiles(M, H_in, H, in_isz, out_isz, budget, ensure_two)
    num_m = pl.cdiv(M, TM)
    num_k = pl.cdiv(H_in, TK)

    need = _vmem_bytes(TM, TK, H, in_isz, out_isz, use_acc=(num_k > 1))
    vmem_limit = int(min(max(need + need // 2 + (1 << 20), 32 << 20), limit_cap))

    # Weight HBM traffic: read once when resident (num_k == 1); re-streamed
    # once per M tile when split-K (its index_map then depends on k).
    w_reads = 1 if num_k == 1 else num_m
    cost = pl.CostEstimate(
        flops=2 * M * H_in * H + 10 * M * H,
        transcendentals=M,  # one rsqrt per row
        bytes_accessed=(M * H_in + w_reads * H_in * H + M * H + 3 * H) * in_isz
        + M * H * out_isz,
    )

    if num_k == 1:
        # Fast path: no accumulator scratch, weight / bias / gamma / beta are
        # VMEM-resident (constant block indices -> single DMA).
        grid_spec = pltpu.PrefetchScalarGridSpec(
            num_scalar_prefetch=0,
            grid=(num_m,),
            in_specs=[
                pl.BlockSpec((TM, H_in), lambda i: (i, 0)),  # activations tile
                pl.BlockSpec((H_in, H), lambda i: (0, 0)),   # weight (resident)
                pl.BlockSpec((1, H), lambda i: (0, 0)),      # bias (resident)
                pl.BlockSpec((TM, H), lambda i: (i, 0)),     # residual tile
                pl.BlockSpec((1, H), lambda i: (0, 0)),      # gamma (resident)
                pl.BlockSpec((1, H), lambda i: (0, 0)),      # beta (resident)
            ],
            out_specs=pl.BlockSpec((TM, H), lambda i: (i, 0)),
        )
        kernel = _self_output_fullk_kernel
        dim_sem = ("parallel",)
    else:
        grid_spec = pltpu.PrefetchScalarGridSpec(
            num_scalar_prefetch=0,
            grid=(num_m, num_k),
            in_specs=[
                pl.BlockSpec((TM, TK), lambda i, k: (i, k)),  # activations tile
                pl.BlockSpec((TK, H), lambda i, k: (k, 0)),   # weight K-slab
                pl.BlockSpec((1, H), lambda i, k: (0, 0)),    # bias (resident)
                pl.BlockSpec((TM, H), lambda i, k: (i, 0)),   # residual tile
                pl.BlockSpec((1, H), lambda i, k: (0, 0)),    # gamma (resident)
                pl.BlockSpec((1, H), lambda i, k: (0, 0)),    # beta (resident)
            ],
            out_specs=pl.BlockSpec((TM, H), lambda i, k: (i, 0)),
            scratch_shapes=[pltpu.VMEM((TM, H), jnp.float32)],
        )
        kernel = _self_output_splitk_kernel
        dim_sem = ("parallel", "arbitrary")

    out2d = pl.pallas_call(
        kernel,
        out_shape=jax.ShapeDtypeStruct((M, H), hidden_states.dtype),
        grid_spec=grid_spec,
        compiler_params=pltpu.CompilerParams(
            dimension_semantics=dim_sem,
            vmem_limit_bytes=vmem_limit,
        ),
        cost_estimate=cost,
    )(x2d, w, b2d, r2d, g2d, be2d)

    return out2d.reshape(B, S, H)


# ----------------------------------------------------------------------------
# Params / reference / self-test
# ----------------------------------------------------------------------------
def init_params(key, hidden_size, num_heads, dtype=jnp.float32):
    h_in = hidden_size * num_heads
    k_w, k_b = jax.random.split(key)
    bound = 1.0 / (h_in ** 0.5)  # torch nn.Linear default init range
    # NOTE: torch Linear stores weight as (out, in); we keep (in, out) for the GEMM.
    w = jax.random.uniform(k_w, (h_in, hidden_size), dtype, minval=-bound, maxval=bound)
    b = jax.random.uniform(k_b, (hidden_size,), dtype, minval=-bound, maxval=bound)
    gamma = jnp.ones((hidden_size,), dtype)
    beta = jnp.zeros((hidden_size,), dtype)
    return {"w": w, "b": b, "gamma": gamma, "beta": beta}


def _reference(hidden_states, input_tensor, params):
    h = jnp.einsum("bsk,kn->bsn", hidden_states, params["w"]) + params["b"]
    y = h + input_tensor
    u = y.mean(-1, keepdims=True)
    s = ((y - u) ** 2).mean(-1, keepdims=True)
    yn = (y - u) / jnp.sqrt(s + LN_EPS)
    return params["gamma"] * yn + params["beta"]


if __name__ == "__main__":
    batch, seq, hidden_size, num_heads = 2, 8, 32, 4
    h_in = hidden_size * num_heads  # 128

    key = jax.random.PRNGKey(0)
    k_p, k_x, k_r = jax.random.split(key, 3)
    params = init_params(k_p, hidden_size, num_heads)
    hidden_states = jax.random.normal(k_x, (batch, seq, h_in), jnp.float32)
    input_tensor = jax.random.normal(k_r, (batch, seq, hidden_size), jnp.float32)

    out = self_output_forward(hidden_states, input_tensor, params)
    out = jax.block_until_ready(out)

    ref = _reference(hidden_states, input_tensor, params)
    assert out.shape == (batch, seq, hidden_size)
    assert jnp.allclose(out, ref, atol=1e-5, rtol=1e-5), "mismatch vs reference"

    print("KERNEL_OK")
</pallas_src>

<mosaic_0001>
module attributes {stable_mosaic.version = 11 : i64} {
  func.func @_self_output_fullk_kernel(%arg0: i32, %arg1: memref<8x128xf32, #tpu.memory_space<vmem>>, %arg2: memref<128x32xf32, #tpu.memory_space<vmem>>, %arg3: memref<1x32xf32, #tpu.memory_space<vmem>>, %arg4: memref<8x32xf32, #tpu.memory_space<vmem>>, %arg5: memref<1x32xf32, #tpu.memory_space<vmem>>, %arg6: memref<1x32xf32, #tpu.memory_space<vmem>>, %arg7: memref<8x32xf32, #tpu.memory_space<vmem>>) attributes {dimension_semantics = [#tpu.dimension_semantics<parallel>], iteration_bounds = array<i64: 2>, scalar_prefetch = 0 : i64, scratch_operands = 0 : i64, tpu.core_type = #tpu.core_type<tc>, window_params = [{transform_indices = @transform_0, window_bounds = array<i64: 8, 128>}, {pipeline_mode = #tpu.pipeline_mode<synchronous>, transform_indices = @transform_1, window_bounds = array<i64: 128, 32>}, {pipeline_mode = #tpu.pipeline_mode<synchronous>, transform_indices = @transform_2, window_bounds = array<i64: 1, 32>}, {transform_indices = @transform_3, window_bounds = array<i64: 8, 32>}, {pipeline_mode = #tpu.pipeline_mode<synchronous>, transform_indices = @transform_4, window_bounds = array<i64: 1, 32>}, {pipeline_mode = #tpu.pipeline_mode<synchronous>, transform_indices = @transform_5, window_bounds = array<i64: 1, 32>}, {transform_indices = @transform_6, window_bounds = array<i64: 8, 32>}]} {
    %c0 = arith.constant 0 : index
    %c0_0 = arith.constant 0 : index
    %0 = vector.load %arg1[%c0, %c0_0] : memref<8x128xf32, #tpu.memory_space<vmem>>, vector<8x128xf32>
    %c0_1 = arith.constant 0 : index
    %c0_2 = arith.constant 0 : index
    %1 = vector.load %arg2[%c0_1, %c0_2] : memref<128x32xf32, #tpu.memory_space<vmem>>, vector<128x32xf32>
    %cst = arith.constant dense<0.000000e+00> : vector<8x32xf32>
    %2 = tpu.matmul %0, %1, %cst {dimension_numbers = #tpu.dot_dimension_numbers<[1], [0], [0], [1], [0, 0, 1, 1], [], []>} : vector<8x128xf32>, vector<128x32xf32>, vector<8x32xf32> -> vector<8x32xf32>
    %c0_3 = arith.constant 0 : index
    %c0_4 = arith.constant 0 : index
    %3 = vector.load %arg3[%c0_3, %c0_4] : memref<1x32xf32, #tpu.memory_space<vmem>>, vector<1x32xf32>
    %4 = vector.broadcast %3 : vector<1x32xf32> to vector<8x32xf32>
    %5 = arith.addf %2, %4 : vector<8x32xf32>
    %c0_5 = arith.constant 0 : index
    %c0_6 = arith.constant 0 : index
    %6 = vector.load %arg4[%c0_5, %c0_6] : memref<8x32xf32, #tpu.memory_space<vmem>>, vector<8x32xf32>
    %7 = arith.addf %5, %6 : vector<8x32xf32>
    %cst_7 = arith.constant dense<0.000000e+00> : vector<8xf32>
    %8 = vector.multi_reduction <add>, %7, %cst_7 [1] : vector<8x32xf32> to vector<8xf32>
    %9 = vector.shape_cast %8 : vector<8xf32> to vector<8x1xf32>
    %cst_8 = arith.constant 3.200000e+01 : f32
    %10 = vector.broadcast %cst_8 : f32 to vector<8x1xf32>
    %11 = arith.divf %9, %10 : vector<8x1xf32>
    %12 = vector.broadcast %11 : vector<8x1xf32> to vector<8x32xf32>
    %13 = arith.subf %7, %12 : vector<8x32xf32>
    %14 = arith.mulf %13, %13 : vector<8x32xf32>
    %cst_9 = arith.constant dense<0.000000e+00> : vector<8xf32>
    %15 = vector.multi_reduction <add>, %14, %cst_9 [1] : vector<8x32xf32> to vector<8xf32>
    %16 = vector.shape_cast %15 : vector<8xf32> to vector<8x1xf32>
    %cst_10 = arith.constant 3.200000e+01 : f32
    %17 = vector.broadcast %cst_10 : f32 to vector<8x1xf32>
    %18 = arith.divf %16, %17 : vector<8x1xf32>
    %cst_11 = arith.constant 9.99999996E-13 : f32
    %19 = vector.broadcast %cst_11 : f32 to vector<8x1xf32>
    %20 = arith.addf %18, %19 : vector<8x1xf32>
    %21 = math.rsqrt %20 : vector<8x1xf32>
    %22 = vector.broadcast %21 : vector<8x1xf32> to vector<8x32xf32>
    %23 = arith.mulf %13, %22 : vector<8x32xf32>
    %c0_12 = arith.constant 0 : index
    %c0_13 = arith.constant 0 : index
    %24 = vector.load %arg5[%c0_12, %c0_13] : memref<1x32xf32, #tpu.memory_space<vmem>>, vector<1x32xf32>
    %25 = vector.broadcast %24 : vector<1x32xf32> to vector<8x32xf32>
    %26 = arith.mulf %25, %23 : vector<8x32xf32>
    %c0_14 = arith.constant 0 : index
    %c0_15 = arith.constant 0 : index
    %27 = vector.load %arg6[%c0_14, %c0_15] : memref<1x32xf32, #tpu.memory_space<vmem>>, vector<1x32xf32>
    %28 = vector.broadcast %27 : vector<1x32xf32> to vector<8x32xf32>
    %29 = arith.addf %26, %28 : vector<8x32xf32>
    %c0_16 = arith.constant 0 : index
    %c0_17 = arith.constant 0 : index
    %30 = vector.load %arg7[%c0_16, %c0_17] : memref<8x32xf32, #tpu.memory_space<vmem>>, vector<8x32xf32>
    tpu.vector_store %arg7[%c0_16, %c0_17], %29 {strides = array<i32>} : memref<8x32xf32, #tpu.memory_space<vmem>>, vector<8x32xf32>,
    return
  }
  func.func @transform_0(%arg0: i32) -> (i32, i32) {
    %c0_i32 = arith.constant 0 : i32
    %c0_i32_0 = arith.constant 0 : i32
    return %arg0, %c0_i32 : i32, i32
  }
  func.func @transform_1(%arg0: i32) -> (i32, i32) {
    %c0_i32 = arith.constant 0 : i32
    %c0_i32_0 = arith.constant 0 : i32
    %c0_i32_1 = arith.constant 0 : i32
    return %c0_i32, %c0_i32_0 : i32, i32
  }
  func.func @transform_2(%arg0: i32) -> (i32, i32) {
    %c0_i32 = arith.constant 0 : i32
    %c0_i32_0 = arith.constant 0 : i32
    %c0_i32_1 = arith.constant 0 : i32
    return %c0_i32, %c0_i32_0 : i32, i32
  }
  func.func @transform_3(%arg0: i32) -> (i32, i32) {
    %c0_i32 = arith.constant 0 : i32
    %c0_i32_0 = arith.constant 0 : i32
    return %arg0, %c0_i32 : i32, i32
  }
  func.func @transform_4(%arg0: i32) -> (i32, i32) {
    %c0_i32 = arith.constant 0 : i32
    %c0_i32_0 = arith.constant 0 : i32
    %c0_i32_1 = arith.constant 0 : i32
    return %c0_i32, %c0_i32_0 : i32, i32
  }
  func.func @transform_5(%arg0: i32) -> (i32, i32) {
    %c0_i32 = arith.constant 0 : i32
    %c0_i32_0 = arith.constant 0 : i32
    %c0_i32_1 = arith.constant 0 : i32
    return %c0_i32, %c0_i32_0 : i32, i32
  }
  func.func @transform_6(%arg0: i32) -> (i32, i32) {
    %c0_i32 = arith.constant 0 : i32
    %c0_i32_0 = arith.constant 0 : i32
    return %arg0, %c0_i32 : i32, i32
  }
}

</mosaic_0001>

<bundles_post_ra>
// kernel: tpu_custom_call.1
= control target key start
LH: loop header
LB: loop body
LE: loop exit
PB: predicated region body
PF: predicated region fallthrough
CT: control target
= control target key end

     0   :  { %11 = vsyncpa [#allocation3], 0  ;;  %s741_s0 = inlined_call_operand.vmem [shape: f32[16,128], index: 0, kind: input, shape index: {}]   ;;  %s742_s1 = inlined_call_operand.vmem [shape: f32[128,32], index: 1, kind: input, shape index: {}]   ;;  %s743_s2 = inlined_call_operand.vmem [shape: f32[1,32], index: 2, kind: input, shape index: {}]   ;;  %s744_s3 = inlined_call_operand.vmem [shape: f32[16,32], index: 3, kind: input, shape index: {}]   ;;  %s745_s4 = inlined_call_operand.vmem [shape: f32[1,32], index: 4, kind: input, shape index: {}]   ;;  %s746_s5 = inlined_call_operand.vmem [shape: f32[1,32], index: 5, kind: input, shape index: {}]   ;;  %s747_s6 = inlined_call_operand.hbm [shape: f32[16,32], index: 6, kind: output, shape index: {}]  }
   0x1   :  { %13 = vsyncpa [#allocation3 + $0x1], 0  ;;  %s593_s21 = smov 0   ;;  %s595_s22 = smov 0  }
   0x2   :  { %s597_s23 = smov 0   ;;  %s599_s24 = smov 0  }
   0x3 LB: > { %s614_s25 = sadd.s32 4294967295, %s555_s24   ;;  %s435_s26 = sadd.s32 4294967294, %s555_s24   ;;  %s555_s24 = sphi %s599_s24, %s753_s24   ;;  %s551_s23 = sphi %s597_s23, %s752_s23   ;;  %s547_s22 = sphi %s595_s22, %s751_s22   ;;  %s543_s21 = sphi %s593_s21, %s750_s21  }
   0x4   : > { %s618_s27 = sadd.s32 1, %s555_s24   ;;  %s162_s28 = sadd.s32 1, %s551_s23 }
   0x5   : > { %s159_s29 = ssub.s32 %s555_s24, %s618_s27  ;;  %p172_p0 = scmp.ne.s32.totalorder %s551_s23, %s547_s22 }
   0x6   : > { %p160_p1 = scmp.eq.s32.totalorder %s159_s29, 0  ;;  %p173_p2 = scmp.eq.s32.totalorder %s614_s25, 1 }
   0x7   : > { %p178_p3 = scmp.ne.s32.totalorder %s547_s22, %s543_s21  ;;  %p179_p4 = scmp.eq.s32.totalorder %s435_s26, 1 }
   0x8   : > { %s629_s30 = scalar_select %p160_p1, %s551_s23, %s162_s28  }
   0x9   : > { %p631_p5 = por %p173_p2, %p172_p0  ;;  %p635_p6 = por %p179_p4, %p178_p3 }
   0xa   : > { %p438_p7 = scmp.ge.s32.totalorder %s555_s24, 1  ;;  %p223_p8 = scmp.lt.s32.totalorder %s555_s24, 3 }
   0xc   : > { %p224_p9 = pnand %p438_p7, %p223_p8 }
   0xd   : > { %p256_p10 = scmp.lt.s32.totalorder (!%p224_p9), %s614_s25, 1  ;;  %s443_s29 = sshll.u32 (!%p224_p9), %s614_s25, 3 }
   0xe   : > { %227 = sbr.rel (%p224_p9) target bundleno = 452 (0x1c4), region = 44 }
  0x13   : > { %v280_v0 = vld [vmem:[%s742_s1 + $0x78] sm:$0xff]  ;;  %v279_v1 = vld [vmem:[%s742_s1 + $0x70] sm:$0xff]  ;;  %v278_v2 = vld [vmem:[%s742_s1 + $0x68] sm:$0xff]  ;;  %s257_s16 = scalar_select %p256_p10, %s614_s25, 1  ;;  %vm307_vm0 = vcmask 261120   ;;  %v557_v23 = vmov 32.0  }
  0x14   : > { %285 = vmatpush.msra.mxu0 %v280_v0  ;;  %v277_v3 = vld [vmem:[%s742_s1 + $0x60] sm:$0xff]  ;;  %v276_v4 = vld [vmem:[%s742_s1 + $0x58] sm:$0xff]  ;;  %v275_v5 = vld [vmem:[%s742_s1 + $0x50] sm:$0xff]  ;;  %489 = vrcp.f32 %v557_v23 }
  0x15   : > { %v274_v6 = vld [vmem:[%s742_s1 + $0x48] sm:$0xff]  ;;  %v273_v7 = vld [vmem:[%s742_s1 + $0x40] sm:$0xff]  ;;  %v272_v8 = vld [vmem:[%s742_s1 + $0x38] sm:$0xff]  ;;  %s440_s26 = sshll.u32 %s257_s16, 3 }
  0x16   : > { %286 = vmatpush.msra.mxu0 %v279_v1  ;;  %v271_v9 = vld [vmem:[%s742_s1 + $0x30] sm:$0xff]  ;;  %v270_v10 = vld [vmem:[%s742_s1 + $0x28] sm:$0xff]  ;;  %v269_v11 = vld [vmem:[%s742_s1 + $0x20] sm:$0xff]  ;;  %s259_s13 = scalar_lea.vmem %s741_s0, %s440_s26  ;;  %s263_s18 = scalar_lea.vmem %s744_s3, %s440_s26 }
  0x17   : > { %v268_v12 = vld [vmem:[%s742_s1 + $0x18] sm:$0xff]  ;;  %v267_v13 = vld [vmem:[%s742_s1 + $0x10] sm:$0xff]  ;;  %v266_v14 = vld [vmem:[%s742_s1 + $0x8] sm:$0xff]  ;;  %s253_s26 = sand.u32 1, %s547_s22  }
  0x18   : > { %287 = vmatpush.msra.mxu0 %v278_v2  ;;  %v265_v15 = vld [vmem:[%s742_s1] sm:$0xff]  ;;  %s439_s28 = sshll.u32 %s253_s26, 3 }
  0x19   : > { %v264_v16 = vld [vmem:[%s259_s13] sm:$0xff]  ;;  %s359_s13 = scalar_lea.hbm %s747_s6, %s443_s29  ;;  %s255_s16 = scalar_lea.vmem [#allocation2], %s439_s28 }
  0x1a   : > { %288 = vmatpush.msra.mxu0 %v277_v3  ;;  %v486_v17 = vld [vmem:[%s743_s2] ss:$0 sm:$0xff]  ;;  %v490_v24 = vpop.eup %489  ;;  %s361_s25 = sshll.u32 %s255_s16, 4  ;;  %s363_s17 = sshll.u32 %s359_s13, 4  ;;  %s362_s25 = int_to_ptr.vmem [resolvable:$true] %s361_s25  ;;  %s364_s17 = int_to_ptr.hbm [resolvable:$true] %s363_s17 }
  0x1b   : > { %v305_v19 = vld [vmem:[%s263_s18] sm:$0xff]  ;;  %v312_v25 = vmul.f32 32.0, %v490_v24  ;;  %vm316_vm1 = vweird.f32 %v490_v24  ;;  %s349_s18 = scalar_lea.sflag [#allocation3], %s253_s26  ;;  %s507_s19 = sshra.s32 %s364_s17, 4  ;;  %s508_s19 = int_to_ptr.hbm [resolvable:$true] %s507_s19 }
  0x1c   : > { %289 = vmatpush.msra.mxu0 %v276_v4  ;;  %v487_v44 = vld [vmem:[%s745_s4] ss:$0 sm:$0xff]  ;;  %s509_s20 = scalar_lea.hbm %s508_s19, 8  ;;  %s513_s28 = scalar_lea.hbm %s747_s6, 16 }
  0x1d   : > { %v313_v26 = vsub.f32 1.0, %v312_v25  ;;  %v488_v47 = vld [vmem:[%s746_s5] ss:$0 sm:$0xff]  ;;  %p510_p11 = scmp.ne.s32.totalorder %s508_s19, %s509_s20  ;;  %p514_p0 = scmp.lt.s32.totalorder %s508_s19, %s747_s6 }
  0x1e   : > { %290 = vmatpush.msra.mxu0 %v275_v5  ;;  %p515_p1 = scmp.lt.s32.totalorder %s513_s28, %s509_s20 }
  0x1f   : > { %v314_v27 = vmul.f32 %v490_v24, %v313_v26  ;;  %p511_p12 = pnand %p510_p11, %p631_p5 }
  0x20   : > { %291 = vmatpush.msra.mxu0 %v274_v6  ;;  %p516_p2 = por %p515_p1, %p514_p0 }
  0x21   : > { %v315_v28 = vadd.f32 %v490_v24, %v314_v27  ;;  %p512_p13 = pneg %p511_p12 }
  0x22   : > { %292 = vmatpush.msra.mxu0 %v273_v7 }
  0x23   : > { %v317_v29 = vsel %vm316_vm1, %v490_v24, %v315_v28  ;;  %p517_p3 = pnand %p516_p2, %p512_p13 }
  0x24   : > { %293 = vmatpush.msra.mxu0 %v272_v8 }
  0x26   : > { %294 = vmatpush.msra.mxu0 %v271_v9 }
  0x28   : > { %295 = vmatpush.msra.mxu0 %v270_v10 }
  0x2a   : > { %296 = vmatpush.msra.mxu0 %v269_v11 }
  0x2c   : > { %297 = vmatpush.msra.mxu0 %v268_v12 }
  0x2e   : > { %298 = vmatpush.msra.mxu0 %v267_v13 }
  0x30   : > { %299 = vmatpush.msra.mxu0 %v266_v14 }
  0x32   : > { %300 = vmatpush.msra.mxu0 %v265_v15 }
  0x33   : > { %301 = vmatmul.f32.vlgmr.msra.gmra.mxu0 %v264_v16 }
  0xb0   : > { %v302_v18 = vpop.f32.mrf.mxu0 }
  0xb1   : > { %v303_v20 = vadd.f32 %v486_v17, %v302_v18 }
  0xb3   : > { %v306_v21 = vadd.f32 %v305_v19, %v303_v20 }
  0xb5   : > { %v308_v22 = vsel %vm307_vm0, %v306_v21, 0.0 }
  0xb6   : > { %309 = vadd.xlane.f32.xlu0 %v308_v22 }
 0x129   : > { %v310_v30 = vpop.xlane.xlu0 %309 }
 0x12a   : > { %v318_v31 = vmul.f32 %v317_v29, %v310_v30 }
 0x12c   : > { %v319_v32 = vsub.f32 %v306_v21, %v318_v31 }
 0x12e   : > { %v320_v33 = vmul.f32 %v319_v32, %v319_v32 }
 0x130   : > { %v321_v34 = vsel %vm307_vm0, %v320_v33, 0.0 }
 0x131   : > { %322 = vadd.xlane.f32.xlu0 %v321_v34 }
 0x1a4   : > { %v323_v35 = vpop.xlane.xlu0 %322 }
 0x1a5   : > { %v324_v36 = vmul.f32 %v323_v35, %v317_v29 }
 0x1a7   : > { %v325_v37 = vadd.f32 1e-12, %v324_v36 }
 0x1a9   : > { %491 = vrsqrt.f32 %v325_v37  ;;  %vm332_vm3 = vweird.f32 %v325_v37 }
 0x1af   : > { %v492_v38 = vpop.eup %491 }
 0x1b0   : > { %v327_v39 = vmul.f32 %v492_v38, %v325_v37  ;;  %vm333_vm2 = vweird.f32 %v492_v38 }
 0x1b1   : > { %vm334_vm4 = vmor %vm332_vm3, %vm333_vm2 }
 0x1b2   : > { %v328_v40 = vmul.f32 %v492_v38, %v327_v39 }
 0x1b4   : > { %v329_v41 = vmul.f32 0.5, %v328_v40 }
 0x1b6   : > { %v330_v42 = vsub.f32 1.5, %v329_v41 }
 0x1b8   : > { %v331_v43 = vmul.f32 %v492_v38, %v330_v42 }
 0x1ba   : > { %v335_v45 = vsel %vm334_vm4, %v492_v38, %v331_v43 }
 0x1bb   : > { %v336_v46 = vmul.f32 %v335_v45, %v319_v32 }
 0x1bd   : > { %v341_v48 = vmul.f32 %v487_v44, %v336_v46 }
 0x1bf   : > { %v346_v49 = vadd.f32 %v488_v47, %v341_v48 }
 0x1c1   : > { %347 = vst.msk [vmem:[%s255_s16] sm:$0xff] %vm307_vm0, %v346_v49 }
 0x1c2   : > { %520 = shalt.err (!%p517_p3)
}
 0x1c3   : > { %446 = dma.vmem_to_hbm [thread:$0]  (%p631_p5), %s362_s25, 128, %s364_s17, %s349_s18  }
 0x1c4 PF: > { %p452_p4 = scmp.ge.s32.totalorder %s555_s24, 2  ;;  %s375_s26 = sand.u32 1, %s543_s21  }
 0x1c5   : > { %s376_s12 = scalar_lea.sflag [#allocation3], %s375_s26 }
 0x1c6   : > { %p449_p7 = pnand %p452_p4, %p635_p6 }
 0x1c8   : > { %p450_p8 = pneg %p449_p7 }
 0x1ca   : > { %538 = dma.done.wait (%p450_p8), %s376_s12, 128  }
 0x1cb   : > { %540 = vsyncadd (%p450_p8), %s376_s12, 4294967168  ;;  %p16_p9 = scmp.ge.s32.totalorder %s618_s27, 4   ;;  %s750_s21 = smov %s547_s22 }
 0x1cc   : > { %s751_s22 = smov %s551_s23  ;;  %s752_s23 = smov %s629_s30 }
 0x1cd   : > { %s753_s24 = smov %s618_s27  ;;  %18 = sbr.rel (!%p16_p9) target bundleno = 3 (0x3), region = 82 }
 0x1d2   :  { %382 = vsyncpa [#allocation3], 1 }
 0x1d3   :  { %384 = vsyncpa [#allocation3 + $0x1], 1 }

</bundles_post_ra>
